<compile_context>
chip_gen: v6e
topology: v6e:2x2x1
jax: 0.10.0
libtpu: 0.0.40
codegen_flags: <defaults>
</compile_context>

<pallas_src>
import functools

import jax
import jax.numpy as jnp
from jax import lax
from jax.experimental import pallas as pl
from jax.experimental.pallas import tpu as pltpu


def _resconv1d_kernel(x_ref, w1_ref, w2_ref, o_ref, *, block_num, true_len, unroll):
    """x_ref: (Nb, C, Lp); w1_ref: (B, mid, C) bf16; w2_ref: (B, C, 3*mid) bf16;
    o_ref: (Nb, C, L)."""
    nb, _, lp = x_ref.shape
    col = lax.broadcasted_iota(jnp.int32, (1, lp), 1)
    left_edge = col == 0
    right_edge = col == (true_len - 1)   # also keeps pad lanes from leaking back in

    for r in range(nb):                  # static & small: rows are independent chains
        x = x_ref[r].astype(jnp.float32)                       # (C, Lp) f32 carry
        if true_len < lp:
            # Over-read lanes (beyond the true length) hold garbage; zero them so
            # the k=3 zero-padding semantics stay exact.
            x = jnp.where(col < true_len, x, 0.0)

        def block_body(b, x):
            # 1x1 conv + ReLU on the MXU: (mid, C) @ (C, Lp), bf16 in / f32 acc.
            y = jnp.dot(w1_ref[b], x.astype(jnp.bfloat16),
                        preferred_element_type=jnp.float32)
            y = jnp.maximum(y, 0.0)                            # (mid, Lp) f32
            # Fused 3-tap conv: stack [y_{l-1}; y_l; y_{l+1}] along sublanes and
            # contract once against the packed (C, 3*mid) weight. Lane rolls go
            # to the XLU; boundary columns are masked to implement zero padding.
            y_m1 = jnp.where(left_edge, 0.0, pltpu.roll(y, shift=1, axis=1))
            y_p1 = jnp.where(right_edge, 0.0, pltpu.roll(y, shift=lp - 1, axis=1))
            taps = jnp.concatenate([y_m1, y, y_p1], axis=0)    # (3*mid, Lp) f32
            z = jnp.dot(w2_ref[b], taps.astype(jnp.bfloat16),
                        preferred_element_type=jnp.float32)
            z = jnp.maximum(z, 0.0)
            return z + x                                       # residual, stays f32

        x = lax.fori_loop(0, block_num, block_body, x, unroll=unroll)
        o_ref[r] = x[:, :true_len].astype(o_ref.dtype)


def _prep_weights(w1_all, w2_all):
    """w1_all: (B, mid, C); w2_all: (B, C, mid, 3) ->
    bf16 (B, mid, C) and bf16 packed (B, C, 3*mid) with W2cat[:, k*mid+m] = w2[:, m, k]."""
    block_num, c, mid, _ = w2_all.shape
    w2cat = jnp.transpose(w2_all, (0, 1, 3, 2)).reshape(block_num, c, 3 * mid)
    return w1_all.astype(jnp.bfloat16), w2cat.astype(jnp.bfloat16)


def _resconv1d_pallas(x, w1_packed, w2_packed):
    """x: (N, C, L). w1_packed: (B, mid, C) bf16. w2_packed: (B, C, 3*mid) bf16."""
    n, c, length = x.shape
    block_num, mid, _ = w1_packed.shape
    lp = ((length + 127) // 128) * 128           # lane width used inside VMEM

    xbytes = x.dtype.itemsize
    weight_bytes = (w1_packed.size + w2_packed.size) * 2 * 2   # bf16, double-buffered

    def step_vmem(nb):                           # VMEM working set for one grid step
        io = 2 * nb * c * lp * xbytes + 2 * nb * c * length * xbytes
        temps = (3 * c + 8 * mid) * lp * 4       # f32 carry/temporaries (rough)
        return io + weight_bytes + temps

    budget = 40 * 1024 * 1024                    # v7x-safe (64 MiB/TC) working-set budget
    nb = 1
    max_nb = min(8, max(1, n // 2))              # keep >= 2 parallel grid steps when N >= 2
    for cand in range(1, max_nb + 1):
        if n % cand == 0 and step_vmem(cand) <= budget:
            nb = cand
    vmem_limit = int(min(max(2 * step_vmem(nb), 32 * 1024 * 1024), 56 * 1024 * 1024))

    flops = 2 * n * block_num * lp * (mid * c + c * 3 * mid)
    bytes_accessed = (2 * n * c * length * xbytes
                      + (w1_packed.size + w2_packed.size) * 2)

    kernel = functools.partial(
        _resconv1d_kernel, block_num=block_num, true_len=length,
        unroll=block_num <= 4)

    return pl.pallas_call(
        kernel,
        out_shape=jax.ShapeDtypeStruct((n, c, length), x.dtype),
        grid=(n // nb,),
        in_specs=[
            # Partial block along L: over-reads up to the 128-aligned lane width;
            # garbage lanes are zeroed in-kernel.
            pl.BlockSpec((nb, c, lp), lambda i: (i, 0, 0)),
            # Grid-constant index_map: weights are DMA'd once for the whole grid.
            pl.BlockSpec((block_num, mid, c), lambda i: (0, 0, 0)),
            pl.BlockSpec((block_num, c, 3 * mid), lambda i: (0, 0, 0)),
        ],
        out_specs=pl.BlockSpec((nb, c, length), lambda i: (i, 0, 0)),
        compiler_params=pltpu.CompilerParams(
            dimension_semantics=("parallel",),   # shard batch steps across TCs (v7x)
            vmem_limit_bytes=vmem_limit,
        ),
        cost_estimate=pl.CostEstimate(
            flops=flops, transcendentals=0, bytes_accessed=bytes_accessed),
    )(x, w1_packed, w2_packed)


def resconv1d_forward(x, w1_all, w2_all):
    """Convenience entry taking original-layout f32 weights."""
    w1p, w2p = _prep_weights(w1_all, w2_all)
    return _resconv1d_pallas(x, w1p, w2p)


class RESCONV1D:
    """JAX/Pallas equivalent of the PyTorch RESCONV1D module (forward only)."""

    def __init__(self, data, key):
        self.data = data
        self.in_num = data["iSize"]
        self.block_num = data["blockNum"]
        self.mid_num = self.in_num // 2
        k1, k2 = jax.random.split(key)
        # Deterministic Conv1d-style init (fan-in uniform); bias=False per spec.
        b1 = 1.0 / float(self.in_num * 1) ** 0.5
        b2 = 1.0 / float(self.mid_num * 3) ** 0.5
        self.w1 = jax.random.uniform(
            k1, (self.block_num, self.mid_num, self.in_num), jnp.float32, -b1, b1)
        self.w2 = jax.random.uniform(
            k2, (self.block_num, self.in_num, self.mid_num, 3), jnp.float32, -b2, b2)
        # Hoist weight packing / bf16 cast out of the per-call path.
        self.w1_packed, self.w2_packed = _prep_weights(self.w1, self.w2)

    def __call__(self, x):
        if isinstance(x, tuple):
            x = x[0]
        return _resconv1d_pallas(x, self.w1_packed, self.w2_packed)


def _reference_forward(x, w1_all, w2_all):
    """Pure-JAX f32 reference matching the PyTorch module semantics."""
    block_num = w1_all.shape[0]
    length = x.shape[-1]
    out = x
    residual = x
    for b in range(block_num):
        y = jnp.maximum(jnp.einsum("mc,ncl->nml", w1_all[b], out), 0.0)
        yp = jnp.pad(y, ((0, 0), (0, 0), (1, 1)))
        z = sum(
            jnp.einsum("cm,nml->ncl", w2_all[b, :, :, k], yp[:, :, k:k + length])
            for k in range(3)
        )
        z = jnp.maximum(z, 0.0)
        out = z + residual
        residual = out
    return out


if __name__ == "__main__":
    data = {"iSize": 32, "blockNum": 2}
    key = jax.random.PRNGKey(0)
    kp, kx = jax.random.split(key)
    model = RESCONV1D(data, kp)

    # NCL input consistent with the module: batch=2, channels=iSize=32, length=16.
    x = jax.random.normal(kx, (2, data["iSize"], 16), dtype=jnp.float32)

    out = jax.block_until_ready(model(x))

    ref = _reference_forward(x, model.w1, model.w2)
    assert out.shape == ref.shape == x.shape
    # bf16 MXU operands with f32 accumulation: compare with a relative L2 error.
    rel = float(jnp.linalg.norm(out - ref) / (jnp.linalg.norm(ref) + 1e-8))
    assert rel < 5e-2, f"relative error too large vs reference: {rel}"

    print("KERNEL_OK")
</pallas_src>

<mosaic_0001>
module attributes {stable_mosaic.version = 11 : i64} {
  func.func @_resconv1d_kernel(%arg0: i32, %arg1: memref<1x32x128xf32, #tpu.memory_space<vmem>>, %arg2: memref<2x16x32xbf16, #tpu.memory_space<vmem>>, %arg3: memref<2x32x48xbf16, #tpu.memory_space<vmem>>, %arg4: memref<1x32x16xf32, #tpu.memory_space<vmem>>) attributes {dimension_semantics = [#tpu.dimension_semantics<parallel>], iteration_bounds = array<i64: 2>, scalar_prefetch = 0 : i64, scratch_operands = 0 : i64, tpu.core_type = #tpu.core_type<tc>, window_params = [{transform_indices = @transform_0, window_bounds = array<i64: 1, 32, 128>}, {pipeline_mode = #tpu.pipeline_mode<synchronous>, transform_indices = @transform_1, window_bounds = array<i64: 2, 16, 32>}, {pipeline_mode = #tpu.pipeline_mode<synchronous>, transform_indices = @transform_2, window_bounds = array<i64: 2, 32, 48>}, {transform_indices = @transform_3, window_bounds = array<i64: 1, 32, 16>}]} {
    %0 = tpu.iota {dimensions = array<i32: 1>} : vector<1x128xi32>
    %c0_i32 = arith.constant 0 : i32
    %1 = vector.broadcast %c0_i32 : i32 to vector<1x128xi32>
    %2 = arith.cmpi eq, %0, %1 : vector<1x128xi32>
    %c15_i32 = arith.constant 15 : i32
    %3 = vector.broadcast %c15_i32 : i32 to vector<1x128xi32>
    %4 = arith.cmpi eq, %0, %3 : vector<1x128xi32>
    %c0 = arith.constant 0 : index
    %c0_0 = arith.constant 0 : index
    %c0_1 = arith.constant 0 : index
    %5 = vector.load %arg1[%c0, %c0_0, %c0_1] : memref<1x32x128xf32, #tpu.memory_space<vmem>>, vector<1x32x128xf32>
    %6 = vector.shape_cast %5 : vector<1x32x128xf32> to vector<32x128xf32>
    %c16_i32 = arith.constant 16 : i32
    %7 = vector.broadcast %c16_i32 : i32 to vector<1x128xi32>
    %8 = arith.cmpi slt, %0, %7 : vector<1x128xi32>
    %cst = arith.constant 0.000000e+00 : f32
    %9 = vector.shape_cast %8 : vector<1x128xi1> to vector<1x128xi1>
    %10 = vector.broadcast %9 : vector<1x128xi1> to vector<32x128xi1>
    %11 = vector.broadcast %cst : f32 to vector<32x128xf32>
    %12 = arith.select %10, %6, %11 : vector<32x128xi1>, vector<32x128xf32>
    %c0_i32_2 = arith.constant 0 : i32
    %13 = arith.index_cast %c0_i32_2 : i32 to index
    %c0_3 = arith.constant 0 : index
    %c0_4 = arith.constant 0 : index
    %14 = vector.load %arg2[%13, %c0_3, %c0_4] : memref<2x16x32xbf16, #tpu.memory_space<vmem>>, vector<1x16x32xbf16>
    %15 = vector.shape_cast %14 : vector<1x16x32xbf16> to vector<16x32xbf16>
    %16 = arith.truncf %12 : vector<32x128xf32> to vector<32x128xbf16>
    %cst_5 = arith.constant dense<0.000000e+00> : vector<16x128xf32>
    %17 = tpu.matmul %15, %16, %cst_5 {dimension_numbers = #tpu.dot_dimension_numbers<[1], [0], [0], [1], [0, 0, 1, 1], [], []>} : vector<16x32xbf16>, vector<32x128xbf16>, vector<16x128xf32> -> vector<16x128xf32>
    %cst_6 = arith.constant 0.000000e+00 : f32
    %18 = vector.broadcast %cst_6 : f32 to vector<16x128xf32>
    %19 = arith.maximumf %17, %18 : vector<16x128xf32>
    %c1_i32 = arith.constant 1 : i32
    %20 = tpu.dynamic_rotate %19 by %c1_i32 dim 1 : vector<16x128xf32>, i32 -> vector<16x128xf32>
    %cst_7 = arith.constant 0.000000e+00 : f32
    %21 = vector.shape_cast %2 : vector<1x128xi1> to vector<1x128xi1>
    %22 = vector.broadcast %21 : vector<1x128xi1> to vector<16x128xi1>
    %23 = vector.broadcast %cst_7 : f32 to vector<16x128xf32>
    %24 = arith.select %22, %23, %20 : vector<16x128xi1>, vector<16x128xf32>
    %c127_i32 = arith.constant 127 : i32
    %25 = tpu.dynamic_rotate %19 by %c127_i32 dim 1 : vector<16x128xf32>, i32 -> vector<16x128xf32>
    %cst_8 = arith.constant 0.000000e+00 : f32
    %26 = vector.shape_cast %4 : vector<1x128xi1> to vector<1x128xi1>
    %27 = vector.broadcast %26 : vector<1x128xi1> to vector<16x128xi1>
    %28 = vector.broadcast %cst_8 : f32 to vector<16x128xf32>
    %29 = arith.select %27, %28, %25 : vector<16x128xi1>, vector<16x128xf32>
    %30 = tpu.concatenate %24, %19, %29 in 0 : vector<16x128xf32>, vector<16x128xf32>, vector<16x128xf32> -> vector<48x128xf32>
    %31 = arith.index_cast %c0_i32_2 : i32 to index
    %c0_9 = arith.constant 0 : index
    %c0_10 = arith.constant 0 : index
    %32 = vector.load %arg3[%31, %c0_9, %c0_10] : memref<2x32x48xbf16, #tpu.memory_space<vmem>>, vector<1x32x48xbf16>
    %33 = vector.shape_cast %32 : vector<1x32x48xbf16> to vector<32x48xbf16>
    %34 = arith.truncf %30 : vector<48x128xf32> to vector<48x128xbf16>
    %cst_11 = arith.constant dense<0.000000e+00> : vector<32x128xf32>
    %35 = tpu.matmul %33, %34, %cst_11 {dimension_numbers = #tpu.dot_dimension_numbers<[1], [0], [0], [1], [0, 0, 1, 1], [], []>} : vector<32x48xbf16>, vector<48x128xbf16>, vector<32x128xf32> -> vector<32x128xf32>
    %cst_12 = arith.constant 0.000000e+00 : f32
    %36 = vector.broadcast %cst_12 : f32 to vector<32x128xf32>
    %37 = arith.maximumf %35, %36 : vector<32x128xf32>
    %38 = arith.addf %37, %12 : vector<32x128xf32>
    %c1_i32_13 = arith.constant 1 : i32
    %39 = arith.index_cast %c1_i32_13 : i32 to index
    %c0_14 = arith.constant 0 : index
    %c0_15 = arith.constant 0 : index
    %40 = vector.load %arg2[%39, %c0_14, %c0_15] : memref<2x16x32xbf16, #tpu.memory_space<vmem>>, vector<1x16x32xbf16>
    %41 = vector.shape_cast %40 : vector<1x16x32xbf16> to vector<16x32xbf16>
    %42 = arith.truncf %38 : vector<32x128xf32> to vector<32x128xbf16>
    %cst_16 = arith.constant dense<0.000000e+00> : vector<16x128xf32>
    %43 = tpu.matmul %41, %42, %cst_16 {dimension_numbers = #tpu.dot_dimension_numbers<[1], [0], [0], [1], [0, 0, 1, 1], [], []>} : vector<16x32xbf16>, vector<32x128xbf16>, vector<16x128xf32> -> vector<16x128xf32>
    %cst_17 = arith.constant 0.000000e+00 : f32
    %44 = vector.broadcast %cst_17 : f32 to vector<16x128xf32>
    %45 = arith.maximumf %43, %44 : vector<16x128xf32>
    %c1_i32_18 = arith.constant 1 : i32
    %46 = tpu.dynamic_rotate %45 by %c1_i32_18 dim 1 : vector<16x128xf32>, i32 -> vector<16x128xf32>
    %cst_19 = arith.constant 0.000000e+00 : f32
    %47 = vector.shape_cast %2 : vector<1x128xi1> to vector<1x128xi1>
    %48 = vector.broadcast %47 : vector<1x128xi1> to vector<16x128xi1>
    %49 = vector.broadcast %cst_19 : f32 to vector<16x128xf32>
    %50 = arith.select %48, %49, %46 : vector<16x128xi1>, vector<16x128xf32>
    %c127_i32_20 = arith.constant 127 : i32
    %51 = tpu.dynamic_rotate %45 by %c127_i32_20 dim 1 : vector<16x128xf32>, i32 -> vector<16x128xf32>
    %cst_21 = arith.constant 0.000000e+00 : f32
    %52 = vector.shape_cast %4 : vector<1x128xi1> to vector<1x128xi1>
    %53 = vector.broadcast %52 : vector<1x128xi1> to vector<16x128xi1>
    %54 = vector.broadcast %cst_21 : f32 to vector<16x128xf32>
    %55 = arith.select %53, %54, %51 : vector<16x128xi1>, vector<16x128xf32>
    %56 = tpu.concatenate %50, %45, %55 in 0 : vector<16x128xf32>, vector<16x128xf32>, vector<16x128xf32> -> vector<48x128xf32>
    %57 = arith.index_cast %c1_i32_13 : i32 to index
    %c0_22 = arith.constant 0 : index
    %c0_23 = arith.constant 0 : index
    %58 = vector.load %arg3[%57, %c0_22, %c0_23] : memref<2x32x48xbf16, #tpu.memory_space<vmem>>, vector<1x32x48xbf16>
    %59 = vector.shape_cast %58 : vector<1x32x48xbf16> to vector<32x48xbf16>
    %60 = arith.truncf %56 : vector<48x128xf32> to vector<48x128xbf16>
    %cst_24 = arith.constant dense<0.000000e+00> : vector<32x128xf32>
    %61 = tpu.matmul %59, %60, %cst_24 {dimension_numbers = #tpu.dot_dimension_numbers<[1], [0], [0], [1], [0, 0, 1, 1], [], []>} : vector<32x48xbf16>, vector<48x128xbf16>, vector<32x128xf32> -> vector<32x128xf32>
    %cst_25 = arith.constant 0.000000e+00 : f32
    %62 = vector.broadcast %cst_25 : f32 to vector<32x128xf32>
    %63 = arith.maximumf %61, %62 : vector<32x128xf32>
    %64 = arith.addf %63, %38 : vector<32x128xf32>
    %c2_i32 = arith.constant 2 : i32
    %65 = vector.extract_strided_slice %64 {offsets = [0, 0], sizes = [32, 16], strides = [1, 1]} : vector<32x128xf32> to vector<32x16xf32>
    %c0_26 = arith.constant 0 : index
    %c0_27 = arith.constant 0 : index
    %c0_28 = arith.constant 0 : index
    %66 = vector.load %arg4[%c0_26, %c0_27, %c0_28] : memref<1x32x16xf32, #tpu.memory_space<vmem>>, vector<1x32x16xf32>
    %67 = vector.shape_cast %66 : vector<1x32x16xf32> to vector<32x16xf32>
    %68 = vector.shape_cast %65 : vector<32x16xf32> to vector<1x32x16xf32>
    tpu.vector_store %arg4[%c0_26, %c0_27, %c0_28], %68 {strides = array<i32>} : memref<1x32x16xf32, #tpu.memory_space<vmem>>, vector<1x32x16xf32>,
    return
  }
  func.func @transform_0(%arg0: i32) -> (i32, i32, i32) {
    %c0_i32 = arith.constant 0 : i32
    %c0_i32_0 = arith.constant 0 : i32
    %c0_i32_1 = arith.constant 0 : i32
    return %arg0, %c0_i32, %c0_i32_0 : i32, i32, i32
  }
  func.func @transform_1(%arg0: i32) -> (i32, i32, i32) {
    %c0_i32 = arith.constant 0 : i32
    %c0_i32_0 = arith.constant 0 : i32
    %c0_i32_1 = arith.constant 0 : i32
    %c0_i32_2 = arith.constant 0 : i32
    return %c0_i32, %c0_i32_0, %c0_i32_1 : i32, i32, i32
  }
  func.func @transform_2(%arg0: i32) -> (i32, i32, i32) {
    %c0_i32 = arith.constant 0 : i32
    %c0_i32_0 = arith.constant 0 : i32
    %c0_i32_1 = arith.constant 0 : i32
    %c0_i32_2 = arith.constant 0 : i32
    return %c0_i32, %c0_i32_0, %c0_i32_1 : i32, i32, i32
  }
  func.func @transform_3(%arg0: i32) -> (i32, i32, i32) {
    %c0_i32 = arith.constant 0 : i32
    %c0_i32_0 = arith.constant 0 : i32
    %c0_i32_1 = arith.constant 0 : i32
    return %arg0, %c0_i32, %c0_i32_0 : i32, i32, i32
  }
}

</mosaic_0001>

<bundles_post_ra>
// kernel: tpu_custom_call.1
= control target key start
LH: loop header
LB: loop body
LE: loop exit
PB: predicated region body
PF: predicated region fallthrough
CT: control target
= control target key end

     0   :  { %s730_s12 = smov 0   ;;  %s830_s0 = inlined_call_operand.vmem [shape: f32[2,32,16], index: 0, kind: input, shape index: {}]   ;;  %s831_s1 = inlined_call_operand.vmem [shape: bf16[2,16,32], index: 1, kind: input, shape index: {}]   ;;  %s832_s2 = inlined_call_operand.vmem [shape: bf16[2,32,48], index: 2, kind: input, shape index: {}]   ;;  %s833_s3 = inlined_call_operand.vmem [shape: f32[2,32,16], index: 3, kind: output, shape index: {}]  }
   0x1 LB: > { %s549_s13 = sadd.s32 4294967295, %s704_s12   ;;  %p553_p0 = scmp.ge.s32.totalorder %s704_s12, 1  ;;  %s704_s12 = sphi %s730_s12, %s13_s12  }
   0x2   : > { %p137_p1 = scmp.lt.s32.totalorder %s704_s12, 3 }
   0x4   : > { %p138_p2 = pnand %p553_p0, %p137_p1 }
   0x5   : > { %p161_p3 = scmp.lt.s32.totalorder (!%p138_p2), %s549_s13, 1  ;;  %s708_s20 = smov (!%p138_p2), 127  }
   0x6   : > { %141 = sbr.rel (%p138_p2) target bundleno = 1102 (0x44e), region = 32  ;;  %s709_s23 = smov (!%p138_p2), 1  }
   0xb   : > { %v172_v0 = vlaneseq  ;;  %v706_v1 = vmov 0.0   ;;  %vm707_vm0 = vmmov 0   ;;  %s839_s13 = smov (!%p161_p3, %s549_s13), 1  ;;  %v692_v9 = vld [vmem:[%s831_s1] sm:$0xff]   ;;  %vm196_vm3 = vcmask 261120   ;;  %v694_v29 = vld [vmem:[%s832_s2 + $0x8] sm:$0xff]  }
   0xc   : > { %624 = vmatprep.subr.bf16.mxu0 %v706_v1  ;;  %628 = vmatprep.mubr.msk.bf16.mxu0 %vm707_vm0, %v706_v1  ;;  %s604_s14 = sshll.u32 %s839_s13, 5  ;;  %v693_v18 = vld [vmem:[%s832_s2] sm:$0xff]   ;;  %vm276_vm4 = vcmask 392192   ;;  %v695_v48 = vld [vmem:[%s831_s1 + $0x8] sm:$0xff]   ;;  %v696_v57 = vld [vmem:[%s832_s2 + $0x10] sm:$0xff]   ;;  %vm489_vm9 = vcmask 130048  }
   0xd   : > { %v743_v2 = vand.u32 127, %v172_v0  ;;  %s165_s17 = scalar_lea.vmem %s830_s0, %s604_s14  ;;  %638 = vmatprep.mubr.msk.bf16.mxu1 %vm276_vm4, %v693_v18  ;;  %s170_s7 = scalar_lea.vmem %s833_s3, %s604_s14 }
   0xe   : > { %v178_v3 = vld [vmem:[%s165_s17 + $0x10] sm:$0xff]  ;;  %v179_v4 = vld [vmem:[%s165_s17 + $0x18] sm:$0xff]  ;;  %v176_v5 = vld [vmem:[%s165_s17] sm:$0xff] }
   0xf   : > { %vm180_vm1 = vcmp.lt.s32.totalorder %v743_v2, 16  ;;  %v560_v6 = vpack.c.bf16 %v179_v4, %v178_v3  ;;  %v177_v7 = vld [vmem:[%s165_s17 + $0x8] sm:$0xff]  ;;  %vm606_vm5 = vcmp.ne.s32.totalorder %v743_v2, 15  ;;  %vm607_vm7 = vcmp.ne.s32.totalorder %v743_v2, 0  ;;  %v697_v2 = vld [vmem:[%s832_s2 + $0x18] sm:$0xff]  }
  0x10   : > { %vm559_vm2 = vmpackc.low %vm180_vm1, %vm180_vm1  ;;  %v563_v8 = vpack.c.bf16 %v177_v7, %v176_v5  ;;  %v185_v33 = vsel %vm180_vm1, %v178_v3, 0.0  ;;  %v186_v34 = vsel %vm180_vm1, %v179_v4, 0.0  ;;  %v184_v37 = vsel %vm180_vm1, %v177_v7, 0.0 }
  0x11   : > { %625 = vmatpush3.bf16.msk.msra.mxu0 %vm559_vm2, %v560_v6  ;;  %vm770_vm6 = vmpackc.low %vm606_vm5, %vm606_vm5  ;;  %v183_v43 = vsel %vm180_vm1, %v176_v5, 0.0 }
  0x12   : > { %626 = vmatprep.subr.bf16.mxu0 %v706_v1  ;;  %vm779_vm8 = vmpackc.low %vm607_vm7, %vm607_vm7 }
  0x15   : > { %627 = vmatpush3.bf16.msk.msra.mxu0 %vm559_vm2, %v563_v8 }
  0x16   : > { %642 = vmatprep.subr.bf16.mxu0 %v706_v1 }
  0x18   : > { %629 = vmatmul.mubr.msk.bf16.vlgmr.msra.gmra.mxu0 %vm196_vm3, %v692_v9 }
  0x19   : > { %646 = vmatprep.mubr.msk.bf16.mxu0 %vm707_vm0, %v706_v1 }
  0xd8   : > { %v234_v10 = vpop.f32.mrf.mxu0 }
  0xd9   : > { %v241_v13 = vmax.f32 %v234_v10, 0.0 }
  0xda   : > { %v630_v11 = vpop.f32.mrf.mxu0 }
  0xdc   : > { %v237_v12 = vpop.f32.mrf.mxu0 }
  0xdd   : > { %v242_v14 = vmax.f32 %v237_v12, 0.0 }
  0xde   : > { %v631_v15 = vpop.f32.mrf.mxu0 }
  0xdf   : > { %v672_v16 = vpack.i.bf16 %v242_v14, %v241_v13  ;;  %v264_v17 = vpack.c.bf16 %v242_v14, %v241_v13 }
  0xe1   : > { %673 = vrot.lane.b32.xlu0 %v672_v16, %s708_s20 }
  0xe5   : > { %678 = vrot.lane.b32.xlu0 %v672_v16, %s709_s23 }
 0x153   : > { %v674_v19 = vpop.permute.xlu0 %673 }
 0x154   : > { %v676_v20 = vunpack.i.h.bf16 %v674_v19  ;;  %v675_v21 = vunpack.i.l.bf16 %v674_v19 }
 0x156   : > { %v571_v23 = vpack.c.bf16 %v676_v20, %v675_v21 }
 0x157   : > { %v679_v24 = vpop.permute.xlu0 %678 }
 0x158   : > { %v681_v25 = vunpack.i.h.bf16 %v679_v24  ;;  %v680_v26 = vunpack.i.l.bf16 %v679_v24  ;;  %632 = vmatprep.subr.msk.bf16.mxu1 %vm770_vm6, %v571_v23 }
 0x159   : > { %633 = vmatpush3.bf16.msk.msra.mxu1 %vm770_vm6, %v571_v23 }
 0x15a   : > { %634 = vmatprep.subr.bf16.mxu1 %v264_v17  ;;  %v576_v28 = vpack.c.bf16 %v681_v25, %v680_v26 }
 0x15d   : > { %635 = vmatpush3.bf16.msra.mxu1 %v264_v17 }
 0x15e   : > { %636 = vmatprep.subr.msk.bf16.mxu1 %vm779_vm8, %v576_v28 }
 0x161   : > { %637 = vmatpush3.bf16.msk.msra.mxu1 %vm779_vm8, %v576_v28 }
 0x164   : > { %639 = vmatmul.mubr.msk.bf16.vlgmr.msra.gmra.mxu1 %vm276_vm4, %v694_v29 }
 0x165   : > { %656 = vmatprep.mubr.msk.bf16.mxu1 %vm276_vm4, %v696_v57 }
 0x224   : > { %v640_v30 = vpop.f32.mrf.mxu1 }
 0x225   : > { %v334_v32 = vmax.f32 %v640_v30, 0.0 }
 0x226   : > { %v317_v31 = vpop.f32.mrf.mxu1 }
 0x227   : > { %v338_v39 = vadd.f32 %v334_v32, %v185_v33  ;;  %v332_v40 = vmax.f32 %v317_v31, 0.0 }
 0x228   : > { %v641_v35 = vpop.f32.mrf.mxu1 }
 0x229   : > { %v335_v36 = vmax.f32 %v641_v35, 0.0  ;;  %v336_v46 = vadd.f32 %v332_v40, %v183_v43 }
 0x22a   : > { %v320_v38 = vpop.f32.mrf.mxu1 }
 0x22b   : > { %v339_v41 = vadd.f32 %v335_v36, %v186_v34  ;;  %v333_v42 = vmax.f32 %v320_v38, 0.0 }
 0x22d   : > { %v344_v44 = vpack.c.bf16 %v339_v41, %v338_v39  ;;  %v337_v45 = vadd.f32 %v333_v42, %v184_v37 }
 0x22f   : > { %643 = vmatpush3.bf16.msra.mxu0 %v344_v44  ;;  %v343_v47 = vpack.c.bf16 %v337_v45, %v336_v46 }
 0x230   : > { %644 = vmatprep.subr.bf16.mxu0 %v706_v1 }
 0x233   : > { %645 = vmatpush3.bf16.msra.mxu0 %v343_v47 }
 0x236   : > { %647 = vmatmul.mubr.msk.bf16.vlgmr.msra.gmra.mxu0 %vm196_vm3, %v695_v48 }
 0x2f6   : > { %v387_v49 = vpop.f32.mrf.mxu0 }
 0x2f7   : > { %v394_v52 = vmax.f32 %v387_v49, 0.0 }
 0x2f8   : > { %v648_v50 = vpop.f32.mrf.mxu0 }
 0x2fa   : > { %v390_v51 = vpop.f32.mrf.mxu0 }
 0x2fb   : > { %v395_v53 = vmax.f32 %v390_v51, 0.0 }
 0x2fc   : > { %v649_v54 = vpop.f32.mrf.mxu0 }
 0x2fd   : > { %v682_v55 = vpack.i.bf16 %v395_v53, %v394_v52  ;;  %v414_v56 = vpack.c.bf16 %v395_v53, %v394_v52 }
 0x2ff   : > { %683 = vrot.lane.b32.xlu1 %v682_v55, %s708_s20 }
 0x303   : > { %688 = vrot.lane.b32.xlu1 %v682_v55, %s709_s23 }
 0x371   : > { %v684_v58 = vpop.permute.xlu1 %683 }
 0x372   : > { %v686_v59 = vunpack.i.h.bf16 %v684_v58  ;;  %v685_v60 = vunpack.i.l.bf16 %v684_v58 }
 0x374   : > { %v593_v61 = vpack.c.bf16 %v686_v59, %v685_v60 }
 0x375   : > { %v689_v62 = vpop.permute.xlu1 %688 }
 0x376   : > { %v691_v63 = vunpack.i.h.bf16 %v689_v62  ;;  %v690_v0 = vunpack.i.l.bf16 %v689_v62  ;;  %650 = vmatprep.subr.msk.bf16.mxu1 %vm770_vm6, %v593_v61 }
 0x377   : > { %651 = vmatpush3.bf16.msk.msra.mxu1 %vm770_vm6, %v593_v61 }
 0x378   : > { %652 = vmatprep.subr.bf16.mxu1 %v414_v56  ;;  %v598_v1 = vpack.c.bf16 %v691_v63, %v690_v0 }
 0x37b   : > { %653 = vmatpush3.bf16.msra.mxu1 %v414_v56 }
 0x37c   : > { %654 = vmatprep.subr.msk.bf16.mxu1 %vm779_vm8, %v598_v1 }
 0x37f   : > { %655 = vmatpush3.bf16.msk.msra.mxu1 %vm779_vm8, %v598_v1 }
 0x382   : > { %657 = vmatmul.mubr.msk.bf16.vlgmr.msra.gmra.mxu1 %vm276_vm4, %v697_v2 }
 0x442   : > { %v658_v3 = vpop.f32.mrf.mxu1 }
 0x443   : > { %v483_v4 = vmax.f32 %v658_v3, 0.0 }
 0x444   : > { %v466_v5 = vpop.f32.mrf.mxu1 }
 0x445   : > { %v487_v6 = vadd.f32 %v483_v4, %v338_v39  ;;  %v481_v7 = vmax.f32 %v466_v5, 0.0 }
 0x446   : > { %v659_v8 = vpop.f32.mrf.mxu1 }
 0x447   : > { %492 = vst.msk [vmem:[%s170_s7 + $0x10] sm:$0xff] %vm489_vm9, %v487_v6  ;;  %v485_v9 = vadd.f32 %v481_v7, %v336_v46  ;;  %v484_v10 = vmax.f32 %v659_v8, 0.0 }
 0x448   : > { %v469_v11 = vpop.f32.mrf.mxu1 }
 0x449   : > { %490 = vst.msk [vmem:[%s170_s7] sm:$0xff] %vm489_vm9, %v485_v9  ;;  %v488_v12 = vadd.f32 %v484_v10, %v339_v41  ;;  %v482_v13 = vmax.f32 %v469_v11, 0.0 }
 0x44b   : > { %493 = vst.msk [vmem:[%s170_s7 + $0x18] sm:$0xff] %vm489_vm9, %v488_v12  ;;  %v486_v14 = vadd.f32 %v482_v13, %v337_v45 }
 0x44d   : > { %491 = vst.msk [vmem:[%s170_s7 + $0x8] sm:$0xff] %vm489_vm9, %v486_v14 }
 0x44e PF: > { %s13_s12 = sadd.s32 1, %s704_s12  }
 0x44f   : > { %p10_p4 = scmp.ge.s32.totalorder %s13_s12, 4  }
 0x451   :  { %12 = sbr.rel (!%p10_p4) target bundleno = 1 (0x1), region = 64 }

</bundles_post_ra>
